<compile_context>
chip_gen: v7x
topology: tpu7x:2x2x1
jax: 0.10.0
libtpu: 0.0.40
codegen_flags: <defaults>
</compile_context>

<pallas_src>
import functools
import math

import jax
import jax.numpy as jnp
from jax.experimental import pallas as pl
from jax.experimental.pallas import tpu as pltpu


def _ceil_to(x, m):
    return ((x + m - 1) // m) * m


def _pad2(a, rpad, cpad):
    if rpad or cpad:
        a = jnp.pad(a, ((0, rpad), (0, cpad)))
    return a


# ----------------------------------------------------------------------------
# Tiled linear (matmul + bias [+ QuickGELU] [+ residual]) — the main kernel
# ----------------------------------------------------------------------------


def _linear_kernel(x_ref, w_ref, b_ref, *rest, activation, has_residual):
    if has_residual:
        r_ref, o_ref, acc_ref = rest
    else:
        o_ref, acc_ref = rest
        r_ref = None

    k = pl.program_id(2)
    nk = pl.num_programs(2)

    @pl.when(k == 0)
    def _():
        acc_ref[...] = jnp.zeros_like(acc_ref)

    acc_ref[...] += jnp.dot(x_ref[...], w_ref[...],
                            preferred_element_type=jnp.float32)

    @pl.when(k == nk - 1)
    def _():
        y = acc_ref[...] + b_ref[...].astype(jnp.float32)
        if activation == "quick_gelu":
            # CLIP QuickGELU: x * sigmoid(1.702 * x)
            y = y * jax.nn.sigmoid(1.702 * y)
        if r_ref is not None:
            y = y + r_ref[...].astype(jnp.float32)
        o_ref[...] = y.astype(o_ref.dtype)


def pallas_linear(x, w, b, *, activation=None, residual=None,
                  out_dtype=jnp.float32, tm=256, tn=512, tk=512):
    """x: (M, K) @ w: (K, N) + b: (N,) [-> act] [+ residual] -> (M, N).

    bf16 operands, f32 accumulation.  M/N/K are zero-padded to tile multiples
    (zero K-padding contributes nothing; padded M/N rows/cols are sliced off).
    """
    M, K = x.shape
    Kw, N = w.shape
    assert K == Kw

    tm = min(tm, _ceil_to(M, 8))
    tn = min(tn, _ceil_to(N, 128))
    tk = min(tk, _ceil_to(K, 128))
    Mp, Np, Kp = _ceil_to(M, tm), _ceil_to(N, tn), _ceil_to(K, tk)

    xp = _pad2(x.astype(jnp.bfloat16), Mp - M, Kp - K)
    wp = _pad2(w.astype(jnp.bfloat16), Kp - K, Np - N)
    bp = jnp.pad(b.astype(jnp.float32), (0, Np - N)).reshape(1, Np)

    inputs = [xp, wp, bp]
    in_specs = [
        pl.BlockSpec((tm, tk), lambda i, j, k: (i, k)),
        pl.BlockSpec((tk, tn), lambda i, j, k: (k, j)),
        pl.BlockSpec((1, tn), lambda i, j, k: (0, j)),
    ]
    has_residual = residual is not None
    if has_residual:
        rp = _pad2(residual.astype(jnp.float32), Mp - M, Np - N)
        inputs.append(rp)
        in_specs.append(pl.BlockSpec((tm, tn), lambda i, j, k: (i, j)))

    kern = functools.partial(_linear_kernel, activation=activation,
                             has_residual=has_residual)
    out = pl.pallas_call(
        kern,
        out_shape=jax.ShapeDtypeStruct((Mp, Np), out_dtype),
        grid=(Mp // tm, Np // tn, Kp // tk),
        in_specs=in_specs,
        out_specs=pl.BlockSpec((tm, tn), lambda i, j, k: (i, j)),
        scratch_shapes=[pltpu.VMEM((tm, tn), jnp.float32)],
        compiler_params=pltpu.CompilerParams(
            dimension_semantics=("parallel", "parallel", "arbitrary"),
            vmem_limit_bytes=48 * 1024 * 1024),
    )(*inputs)
    return out[:M, :N]


# ----------------------------------------------------------------------------
# Tiled LayerNorm (rows pipelined, "parallel" grid)
# ----------------------------------------------------------------------------


def _layernorm_kernel(x_ref, g_ref, b_ref, o_ref):
    x = x_ref[...].astype(jnp.float32)
    mu = jnp.mean(x, axis=-1, keepdims=True)
    var = jnp.mean(jnp.square(x - mu), axis=-1, keepdims=True)
    y = (x - mu) * jax.lax.rsqrt(var + 1e-5)
    o_ref[...] = (y * g_ref[...] + b_ref[...]).astype(o_ref.dtype)


def pallas_layernorm(x, g, b, *, tm=512):
    """x: (N, H), g/b: (H,)."""
    N, H = x.shape
    tm = min(tm, _ceil_to(N, 8))
    Np = _ceil_to(N, tm)
    xp = jnp.pad(x, ((0, Np - N), (0, 0))) if Np != N else x
    g2 = g.reshape(1, H).astype(jnp.float32)
    b2 = b.reshape(1, H).astype(jnp.float32)
    out = pl.pallas_call(
        _layernorm_kernel,
        out_shape=jax.ShapeDtypeStruct((Np, H), x.dtype),
        grid=(Np // tm,),
        in_specs=[
            pl.BlockSpec((tm, H), lambda i: (i, 0)),
            pl.BlockSpec((1, H), lambda i: (0, 0)),
            pl.BlockSpec((1, H), lambda i: (0, 0)),
        ],
        out_specs=pl.BlockSpec((tm, H), lambda i: (i, 0)),
        compiler_params=pltpu.CompilerParams(
            dimension_semantics=("parallel",)),
    )(xp, g2, b2)
    return out[:N]


# ----------------------------------------------------------------------------
# Attention — a block of (batch*head) items per grid step, batched einsum on
# the MXU (bf16 operands, f32 softmax stats, approx reciprocal on the EUP).
# ----------------------------------------------------------------------------


def _attention_kernel(q_ref, k_ref, v_ref, o_ref, *, scale):
    q = q_ref[...]
    k = k_ref[...]
    v = v_ref[...]
    # (blk, S, D) x (blk, S, D) -> (blk, S, S)
    s = jnp.einsum("bqd,bkd->bqk", q, k,
                   preferred_element_type=jnp.float32) * scale
    m = jnp.max(s, axis=-1, keepdims=True)
    p = jnp.exp(s - m)
    denom = jnp.sum(p, axis=-1, keepdims=True)
    p = p * pl.reciprocal(denom, approx=True)
    o = jnp.einsum("bqk,bkd->bqd", p.astype(v.dtype), v,
                   preferred_element_type=jnp.float32)
    o_ref[...] = o.astype(o_ref.dtype)


def pallas_attention(q, k, v, scale, *, bh_block=8):
    """q/k/v: (B*heads, S, head_dim) bf16 -> (B*heads, S, head_dim) bf16."""
    BH, S, Dh = q.shape
    blk = min(bh_block, BH)
    BHp = _ceil_to(BH, blk)
    if BHp != BH:
        pad = ((0, BHp - BH), (0, 0), (0, 0))
        q, k, v = jnp.pad(q, pad), jnp.pad(k, pad), jnp.pad(v, pad)
    # TODO(synk): head_dim < 128 means the output store is not lane-dense;
    # packing heads onto the lane axis would need in-kernel relayouts that are
    # not worth the risk at these shapes.
    kern = functools.partial(_attention_kernel, scale=scale)
    spec = pl.BlockSpec((blk, S, Dh), lambda i: (i, 0, 0))
    out = pl.pallas_call(
        kern,
        out_shape=jax.ShapeDtypeStruct((BHp, S, Dh), jnp.bfloat16),
        grid=(BHp // blk,),
        in_specs=[spec, spec, spec],
        out_specs=spec,
        compiler_params=pltpu.CompilerParams(
            dimension_semantics=("parallel",),
            vmem_limit_bytes=48 * 1024 * 1024),
    )(q, k, v)
    return out[:BH]


# ----------------------------------------------------------------------------
# CLIP vision model (embeddings + pre-LN + transformer encoder)
# ----------------------------------------------------------------------------


def make_clip_params(key, *, channels, patch_size, image_size, hidden, heads,
                     intermediate, num_layers):
    keys = jax.random.split(key, 4 + num_layers)
    num_patches = (image_size // patch_size) ** 2
    num_positions = num_patches + 1

    def w(k, shape, scale=0.02):
        return (scale * jax.random.normal(k, shape)).astype(jnp.bfloat16)

    params = {
        "patch_size": patch_size,
        "hidden": hidden,
        "num_heads": heads,
        # conv weight reshaped to (C*P*P, hidden); conv has no bias in CLIP
        "patch_w": w(keys[0], (channels * patch_size * patch_size, hidden)),
        "patch_b": jnp.zeros((hidden,), jnp.float32),
        "class_embedding": 0.02 * jax.random.normal(keys[1], (hidden,), jnp.float32),
        "pos_embedding": 0.02 * jax.random.normal(keys[2], (num_positions, hidden),
                                                  jnp.float32),
        "pre_ln_g": jnp.ones((hidden,), jnp.float32),
        "pre_ln_b": jnp.zeros((hidden,), jnp.float32),
        "layers": [],
    }
    for li in range(num_layers):
        lk = jax.random.split(keys[4 + li], 6)
        params["layers"].append({
            "ln1_g": jnp.ones((hidden,), jnp.float32),
            "ln1_b": jnp.zeros((hidden,), jnp.float32),
            # fused Q|K|V projection
            "w_qkv": jnp.concatenate([w(lk[0], (hidden, hidden)),
                                      w(lk[1], (hidden, hidden)),
                                      w(lk[2], (hidden, hidden))], axis=1),
            "b_qkv": jnp.zeros((3 * hidden,), jnp.float32),
            "wo": w(lk[3], (hidden, hidden)),
            "bo": jnp.zeros((hidden,), jnp.float32),
            "ln2_g": jnp.ones((hidden,), jnp.float32),
            "ln2_b": jnp.zeros((hidden,), jnp.float32),
            "w_fc1": w(lk[4], (hidden, intermediate)),
            "b_fc1": jnp.zeros((intermediate,), jnp.float32),
            "w_fc2": w(lk[5], (intermediate, hidden)),
            "b_fc2": jnp.zeros((hidden,), jnp.float32),
        })
    return params


def clip_vision_hidden_states(params, images):
    """images: (B, C, H, W). Returns list of hidden states (B, S, hidden)."""
    B, C, H, W = images.shape
    P = params["patch_size"]
    hidden = params["hidden"]
    heads = params["num_heads"]
    dh = hidden // heads
    nH, nW = H // P, W // P

    # Patch embedding: unfold NCHW into (B*nH*nW, C*P*P), matmul in Pallas
    # (the ragged K dim C*P*P is zero-padded to a 128 multiple inside
    # pallas_linear).
    x = images.reshape(B, C, nH, P, nW, P)
    x = x.transpose(0, 2, 4, 1, 3, 5).reshape(B * nH * nW, C * P * P)
    patch_embeds = pallas_linear(x, params["patch_w"], params["patch_b"])
    patch_embeds = patch_embeds.reshape(B, nH * nW, hidden)

    cls = jnp.broadcast_to(params["class_embedding"].reshape(1, 1, hidden),
                           (B, 1, hidden))
    h = jnp.concatenate([cls, patch_embeds], axis=1)            # (B, S, hidden)
    # TODO(synk): no position-embedding interpolation path; crops must equal
    # the pretrained image_size (true for the S2 configuration used here).
    h = h + params["pos_embedding"][None, :, :]
    S = h.shape[1]

    def ln(x3, g, b):
        return pallas_layernorm(x3.reshape(-1, hidden), g, b).reshape(x3.shape)

    h = ln(h, params["pre_ln_g"], params["pre_ln_b"])           # pre_layrnorm
    hidden_states = [h]

    def split_heads(t):     # (B*S, hidden) -> (B*heads, S, dh), bf16
        return (t.reshape(B, S, heads, dh).transpose(0, 2, 1, 3)
                 .reshape(B * heads, S, dh).astype(jnp.bfloat16))

    for layer in params["layers"]:
        residual = h.reshape(B * S, hidden)
        x2 = ln(h, layer["ln1_g"], layer["ln1_b"]).reshape(B * S, hidden)
        qkv = pallas_linear(x2, layer["w_qkv"], layer["b_qkv"])      # fused QKV
        q = qkv[:, :hidden]
        k = qkv[:, hidden:2 * hidden]
        v = qkv[:, 2 * hidden:]
        o = pallas_attention(split_heads(q), split_heads(k), split_heads(v),
                             scale=dh ** -0.5)
        o = (o.reshape(B, heads, S, dh).transpose(0, 2, 1, 3)
              .reshape(B * S, hidden))
        # residual add fused into the out-projection epilogue
        h = pallas_linear(o, layer["wo"], layer["bo"],
                          residual=residual).reshape(B, S, hidden)

        residual = h.reshape(B * S, hidden)
        x2 = ln(h, layer["ln2_g"], layer["ln2_b"]).reshape(B * S, hidden)
        m = pallas_linear(x2, layer["w_fc1"], layer["b_fc1"],
                          activation="quick_gelu")
        h = pallas_linear(m, layer["w_fc2"], layer["b_fc2"],
                          residual=residual).reshape(B, S, hidden)
        hidden_states.append(h)

    return hidden_states


# ----------------------------------------------------------------------------
# CLIPVisionTowerS2 (feature_select + s2wrapper multiscale_forward)
# ----------------------------------------------------------------------------


class CLIPVisionTowerS2JAX:
    def __init__(self, params, *, s2_scales, select_layer=-2, select_feature="patch"):
        self.params = params
        self.s2_scales = sorted(s2_scales)
        self.s2_split_size = self.s2_scales[0]
        self.s2_image_size = self.s2_scales[-1]
        self.select_layer = select_layer
        self.select_feature = select_feature

    def feature_select(self, hidden_states):
        feats = hidden_states[self.select_layer]
        if self.select_feature == "patch":
            feats = feats[:, 1:]                                # drop CLS token
        elif self.select_feature != "cls_patch":
            raise ValueError(self.select_feature)
        return feats

    def forward_feature(self, images):
        hs = clip_vision_hidden_states(self.params, images)
        return self.feature_select(hs).astype(images.dtype)

    def multiscale_forward(self, images):
        """s2wrapper.forward: multi-scale, chessboard split/merge, concat on C.

        All crops from all scales are the same spatial size, so they are batched
        into a single forward_feature call (weights streamed from HBM once).
        """
        B, C, H, W = images.shape
        assert H == W
        img_sizes = self.s2_scales
        num_splits = [max(math.ceil(s / self.s2_split_size), 1) for s in img_sizes]

        crops_per_scale = []
        for size, ns in zip(img_sizes, num_splits):
            xi = images
            if size != H:
                # TODO(synk): jax.image cubic resize is not bit-identical to
                # torch.nn.functional.interpolate(mode='bicubic').
                xi = jax.image.resize(images.astype(jnp.float32),
                                      (B, C, size, size),
                                      method="cubic").astype(images.dtype)
            crop = size // ns
            crops = [xi[:, :, i * crop:(i + 1) * crop, j * crop:(j + 1) * crop]
                     for i in range(ns) for j in range(ns)]
            crops_per_scale.append(jnp.concatenate(crops, axis=0))

        counts = [c.shape[0] for c in crops_per_scale]
        batched = jnp.concatenate(crops_per_scale, axis=0)   # (sum crops, C, s, s)
        feats_all = self.forward_feature(batched)            # (sum crops, N, hid)

        outs = []
        offset = 0
        for (size, ns), cnt in zip(zip(img_sizes, num_splits), counts):
            feat = feats_all[offset:offset + cnt]
            offset += cnt
            n = feat.shape[1]
            hw = int(round(math.sqrt(n)))
            feat = feat.reshape(cnt, hw, hw, feat.shape[-1])
            feat = feat.transpose(0, 3, 1, 2)                 # b c h w
            # merge_chessboard
            rows = [jnp.concatenate([feat[(i * ns + j) * B:(i * ns + j + 1) * B]
                                     for j in range(ns)], axis=-1)
                    for i in range(ns)]
            feat = jnp.concatenate(rows, axis=-2)             # (B, hid, hw*ns, hw*ns)
            outs.append(feat)

        # area-interpolate every scale to the smallest grid, concat on channels
        out_size = outs[0].shape[-1]
        merged = []
        for f in outs:
            s = f.shape[-1]
            if s != out_size:
                factor = s // out_size                        # integer area pooling
                f = f.reshape(B, f.shape[1], out_size, factor, out_size, factor)
                f = f.mean(axis=(3, 5))
            merged.append(f)
        out = jnp.concatenate(merged, axis=1)                 # (B, hid*scales, h, w)
        out = out.transpose(0, 2, 3, 1).reshape(B, out_size * out_size, -1)
        return out

    def __call__(self, images):
        if isinstance(images, list):
            return [self.multiscale_forward(img[None]) for img in images]
        return self.multiscale_forward(images)


# ----------------------------------------------------------------------------
# Demo
# ----------------------------------------------------------------------------

if __name__ == "__main__":
    key = jax.random.PRNGKey(0)
    k_img, k_par = jax.random.split(key)

    # Small, shape-consistent config: per-crop image size 16, patch 8 ->
    # 2x2 patches per crop (+CLS), scales (16, 32), input at the largest scale.
    channels = 3
    patch_size = 8
    crop_size = 16            # corresponds to 224 in the real model
    s2_scales = (16, 32)      # corresponds to (224, 448)
    hidden = 32
    heads = 2
    intermediate = 64
    num_layers = 2            # select_layer=-2 picks output of layer 1

    params = make_clip_params(
        k_par, channels=channels, patch_size=patch_size, image_size=crop_size,
        hidden=hidden, heads=heads, intermediate=intermediate,
        num_layers=num_layers)

    tower = CLIPVisionTowerS2JAX(params, s2_scales=s2_scales,
                                 select_layer=-2, select_feature="patch")

    images = jax.random.normal(
        k_img, (2, channels, s2_scales[-1], s2_scales[-1]), dtype=jnp.float32)

    feats = tower(images)
    feats = jax.block_until_ready(feats)

    expected_tokens = (crop_size // patch_size) ** 2
    assert feats.shape == (2, expected_tokens, hidden * len(s2_scales)), feats.shape
    assert bool(jnp.all(jnp.isfinite(feats)))
    print("KERNEL_OK")
</pallas_src>

<mosaic_0001>
module attributes {stable_mosaic.version = 11 : i64} {
  func.func @_linear_kernel(%arg0: i32, %arg1: i32, %arg2: i32, %arg3: memref<40x256xbf16, #tpu.memory_space<vmem>>, %arg4: memref<256x128xbf16, #tpu.memory_space<vmem>>, %arg5: memref<1x128xf32, #tpu.memory_space<vmem>>, %arg6: memref<40x128xf32, #tpu.memory_space<vmem>>, %arg7: memref<40x128xf32, #tpu.memory_space<vmem>>) attributes {dimension_semantics = [#tpu.dimension_semantics<parallel>, #tpu.dimension_semantics<parallel>, #tpu.dimension_semantics<arbitrary>], iteration_bounds = array<i64: 1, 1, 1>, scalar_prefetch = 0 : i64, scratch_operands = 1 : i64, tpu.core_type = #tpu.core_type<tc>, window_params = [{transform_indices = @transform_0, window_bounds = array<i64: 40, 256>}, {transform_indices = @transform_1, window_bounds = array<i64: 256, 128>}, {transform_indices = @transform_2, window_bounds = array<i64: 1, 128>}, {transform_indices = @transform_3, window_bounds = array<i64: 40, 128>}]} {
    %c0_i32 = arith.constant 0 : i32
    %0 = arith.cmpi eq, %arg2, %c0_i32 : i32
    %1 = arith.extui %0 : i1 to i32
    %c0_i32_0 = arith.constant 0 : i32
    %2 = arith.cmpi ne, %1, %c0_i32_0 : i32
    scf.if %2 {
      %cst_10 = arith.constant 0.000000e+00 : f32
      %12 = vector.broadcast %cst_10 : f32 to vector<40x128xf32>
      %c0_11 = arith.constant 0 : index
      %c0_12 = arith.constant 0 : index
      %13 = vector.load %arg7[%c0_11, %c0_12] : memref<40x128xf32, #tpu.memory_space<vmem>>, vector<40x128xf32>
      tpu.vector_store %arg7[%c0_11, %c0_12], %12 {strides = array<i32>} : memref<40x128xf32, #tpu.memory_space<vmem>>, vector<40x128xf32>,
    } else {
    }
    %c0 = arith.constant 0 : index
    %c0_1 = arith.constant 0 : index
    %3 = vector.load %arg7[%c0, %c0_1] : memref<40x128xf32, #tpu.memory_space<vmem>>, vector<40x128xf32>
    %c0_2 = arith.constant 0 : index
    %c0_3 = arith.constant 0 : index
    %4 = vector.load %arg3[%c0_2, %c0_3] : memref<40x256xbf16, #tpu.memory_space<vmem>>, vector<40x256xbf16>
    %c0_4 = arith.constant 0 : index
    %c0_5 = arith.constant 0 : index
    %5 = vector.load %arg4[%c0_4, %c0_5] : memref<256x128xbf16, #tpu.memory_space<vmem>>, vector<256x128xbf16>
    %cst = arith.constant dense<0.000000e+00> : vector<40x128xf32>
    %6 = tpu.matmul %4, %5, %cst {dimension_numbers = #tpu.dot_dimension_numbers<[1], [0], [0], [1], [0, 0, 1, 1], [], []>} : vector<40x256xbf16>, vector<256x128xbf16>, vector<40x128xf32> -> vector<40x128xf32>
    %7 = arith.addf %3, %6 : vector<40x128xf32>
    %c0_6 = arith.constant 0 : index
    %c0_7 = arith.constant 0 : index
    %8 = vector.load %arg7[%c0_6, %c0_7] : memref<40x128xf32, #tpu.memory_space<vmem>>, vector<40x128xf32>
    tpu.vector_store %arg7[%c0_6, %c0_7], %7 {strides = array<i32>} : memref<40x128xf32, #tpu.memory_space<vmem>>, vector<40x128xf32>,
    %c0_i32_8 = arith.constant 0 : i32
    %9 = arith.cmpi eq, %arg2, %c0_i32_8 : i32
    %10 = arith.extui %9 : i1 to i32
    %c0_i32_9 = arith.constant 0 : i32
    %11 = arith.cmpi ne, %10, %c0_i32_9 : i32
    scf.if %11 {
      %c0_10 = arith.constant 0 : index
      %c0_11 = arith.constant 0 : index
      %12 = vector.load %arg7[%c0_10, %c0_11] : memref<40x128xf32, #tpu.memory_space<vmem>>, vector<40x128xf32>
      %c0_12 = arith.constant 0 : index
      %c0_13 = arith.constant 0 : index
      %13 = vector.load %arg5[%c0_12, %c0_13] : memref<1x128xf32, #tpu.memory_space<vmem>>, vector<1x128xf32>
      %14 = vector.broadcast %13 : vector<1x128xf32> to vector<40x128xf32>
      %15 = arith.addf %12, %14 : vector<40x128xf32>
      %c0_14 = arith.constant 0 : index
      %c0_15 = arith.constant 0 : index
      %16 = vector.load %arg6[%c0_14, %c0_15] : memref<40x128xf32, #tpu.memory_space<vmem>>, vector<40x128xf32>
      tpu.vector_store %arg6[%c0_14, %c0_15], %15 {strides = array<i32>} : memref<40x128xf32, #tpu.memory_space<vmem>>, vector<40x128xf32>,
    } else {
    }
    return
  }
  func.func @transform_0(%arg0: i32, %arg1: i32, %arg2: i32) -> (i32, i32) {
    %c0_i32 = arith.constant 0 : i32
    return %arg0, %arg2 : i32, i32
  }
  func.func @transform_1(%arg0: i32, %arg1: i32, %arg2: i32) -> (i32, i32) {
    %c0_i32 = arith.constant 0 : i32
    return %arg2, %arg1 : i32, i32
  }
  func.func @transform_2(%arg0: i32, %arg1: i32, %arg2: i32) -> (i32, i32) {
    %c0_i32 = arith.constant 0 : i32
    %c0_i32_0 = arith.constant 0 : i32
    return %c0_i32, %arg1 : i32, i32
  }
  func.func @transform_3(%arg0: i32, %arg1: i32, %arg2: i32) -> (i32, i32) {
    %c0_i32 = arith.constant 0 : i32
    return %arg0, %arg1 : i32, i32
  }
}

</mosaic_0001>

<bundles_post_ra>
// kernel: tpu_custom_call.1
= control target key start
LH: loop header
LB: loop body
LE: loop exit
PB: predicated region body
PF: predicated region fallthrough
CT: control target
= control target key end

     0   :  { %8 = vsyncpa [#allocation4], 0  ;;  %s575_s0 = inlined_call_operand.hbm [shape: bf16[40,256], index: 0, kind: input, shape index: {}]   ;;  %s576_s1 = inlined_call_operand.hbm [shape: bf16[256,128], index: 1, kind: input, shape index: {}]   ;;  %s577_s2 = inlined_call_operand.vmem [shape: f32[1,128], index: 2, kind: input, shape index: {}]   ;;  %s578_s3 = inlined_call_operand.hbm [shape: f32[40,128], index: 3, kind: output, shape index: {}]  }
   0x1   :  { %9 = vsyncpa [#allocation7], 0 }
   0x2   :  { %10 = vsyncpa [#allocation5], 0  ;;  %s503_s12 = smov [#allocation3]   ;;  %s431_s16 = scalar_lea.hbm %s575_s0, 640 }
   0x3   :  { %s16_s13 = sshll.u32 %s503_s12, 4  ;;  %p432_p0 = scmp.ne.s32.totalorder %s575_s0, %s431_s16  ;;  %s17_s13 = int_to_ptr.vmem [resolvable:$true] %s16_s13 }
   0x4   :  { %p435_p1 = scmp.lt.u32.totalorder %s431_s16, %s575_s0 }
   0x6   :  { %p437_p2 = pnand %p435_p1, %p432_p0 }
   0x8   :  { %440 = shalt.err (!%p437_p2)
}
   0x9   :  { %s441_s21 = scalar_lea.vmem %s17_s13, 640  ;;  %p446_p4 = scmp.lt.s32.totalorder %s17_s13, %s17_s13 }
   0xa   :  { %p442_p3 = scmp.ne.s32.totalorder %s17_s13, %s441_s21  ;;  %p447_p5 = scmp.lt.s32.totalorder %s441_s21, %s441_s21 }
   0xc   :  { %p448_p6 = por %p447_p5, %p446_p4 }
   0xe   :  { %p449_p7 = pnand %p448_p6, %p442_p3 }
  0x10   :  { %452 = shalt.err (!%p449_p7)
}
  0x11   :  { %s504_s22 = smov 128   ;;  %s505_s23 = smov 8  }
  0x12   :  { %22 = dma.hbm_to_vmem [thread:$0]  %s575_s0, 640, %s17_s13, [#allocation4], %s504_s22, %s504_s22, %s505_s23  }
  0x13   :  { %s506_s26 = smov [#allocation6]   ;;  %s453_s30 = scalar_lea.hbm %s576_s1, 2048 }
  0x14   :  { %s28_s27 = sshll.u32 %s506_s26, 4  ;;  %p454_p8 = scmp.ne.s32.totalorder %s576_s1, %s453_s30  ;;  %s29_s27 = int_to_ptr.vmem [resolvable:$true] %s28_s27 }
  0x15   :  { %p457_p9 = scmp.lt.u32.totalorder %s453_s30, %s576_s1 }
  0x17   :  { %p459_p10 = pnand %p457_p9, %p454_p8 }
  0x19   :  { %462 = shalt.err (!%p459_p10)
}
  0x1a   :  { %s463_s8 = scalar_lea.vmem %s29_s27, 2048  ;;  %p468_p12 = scmp.lt.s32.totalorder %s29_s27, %s29_s27 }
  0x1b   :  { %p464_p11 = scmp.ne.s32.totalorder %s29_s27, %s463_s8  ;;  %p469_p13 = scmp.lt.s32.totalorder %s463_s8, %s463_s8 }
  0x1d   :  { %p470_p0 = por %p469_p13, %p468_p12 }
  0x1f   :  { %p471_p1 = pnand %p470_p0, %p464_p11 }
  0x21   :  { %474 = shalt.err (!%p471_p1)
}
  0x22   :  { %s507_s0 = smov 64   ;;  %s508_s9 = smov 4  }
  0x23   :  { %34 = dma.hbm_to_vmem [thread:$0]  %s576_s1, 2048, %s29_s27, [#allocation7], %s507_s0, %s507_s0, %s508_s9  }
  0x24   :  { %497 = dma.done.wait [#allocation4], 640  }
  0x25   :  { %498 = vsyncadd [#allocation4], 4294966656 }
  0x26   :  { %499 = dma.done.wait [#allocation7], 2048  }
  0x27   :  { %500 = vsyncadd [#allocation7], 4294965248  ;;  %v407_v0 = vld [vmem:[#allocation6 + $0x40] sm:$0xff]   ;;  %v409_v2 = vld [vmem:[#allocation6 + $0x48] sm:$0xff]  }
  0x28   :  { %v408_v1 = vld [vmem:[#allocation6] sm:$0xff]   ;;  %384 = vmatprep.subr.bf16.mxu1 %v407_v0  ;;  %350 = vmatprep.subr.bf16.mxu0 %v407_v0  ;;  %v410_v3 = vld [vmem:[#allocation6 + $0x8] sm:$0xff]   ;;  %v411_v4 = vld [vmem:[#allocation6 + $0x50] sm:$0xff]  }
  0x29   :  { %392 = vmatpush3.bf16.msra.mxu1 %v408_v1  ;;  %351 = vmatpush3.bf16.msra.mxu0 %v408_v1  ;;  %v412_v5 = vld [vmem:[#allocation6 + $0x10] sm:$0xff]   ;;  %v413_v6 = vld [vmem:[#allocation6 + $0x58] sm:$0xff]   ;;  %v415_v8 = vld [vmem:[#allocation6 + $0x60] sm:$0xff]  }
  0x2a   :  { %385 = vmatprep.subr.bf16.mxu1 %v409_v2  ;;  %352 = vmatprep.subr.bf16.mxu0 %v409_v2  ;;  %v414_v7 = vld [vmem:[#allocation6 + $0x18] sm:$0xff]   ;;  %v416_v9 = vld [vmem:[#allocation6 + $0x20] sm:$0xff]   ;;  %v417_v10 = vld [vmem:[#allocation6 + $0x68] sm:$0xff]  }
  0x2b   :  { %v425_v11 = vld [vmem:[#allocation3 + $0x14] ss:$8 sps:$4 sm:$0xff]   ;;  %v428_v12 = vld [vmem:[#allocation3 + $0x4] ss:$8 sps:$4 sm:$0xff]   ;;  %v423_v19 = vld [vmem:[#allocation3 + $0x10] ss:$8 sps:$4 sm:$0xff]  }
  0x2c   :  { %v418_v13 = vld [vmem:[#allocation6 + $0x28] sm:$0xff]   ;;  %v419_v14 = vld [vmem:[#allocation6 + $0x70] sm:$0xff]   ;;  %258 = vmatprep.mubr.bf16.mxu1 %v425_v11  ;;  %250 = vmatprep.mubr.bf16.mxu0 %v428_v12  ;;  %v421_v16 = vld [vmem:[#allocation6 + $0x78] sm:$0xff]  }
  0x2d   :  { %393 = vmatpush3.bf16.msra.mxu1 %v410_v3  ;;  %353 = vmatpush3.bf16.msra.mxu0 %v410_v3  ;;  %v420_v15 = vld [vmem:[#allocation6 + $0x30] sm:$0xff]   ;;  %v422_v17 = vld [vmem:[#allocation6 + $0x38] sm:$0xff]  }
  0x2e   :  { %386 = vmatprep.subr.bf16.mxu1 %v411_v4  ;;  %354 = vmatprep.subr.bf16.mxu0 %v411_v4  ;;  %v62_v18 = vld [vmem:[#allocation3 + $0x20] sm:$0xff] }
  0x2f   :  { %v426_v20 = vld [vmem:[#allocation3] ss:$8 sps:$4 sm:$0xff]   ;;  %v332_v21 = vcombine.high %v62_v18, %v62_v18  ;;  %v331_v22 = vcombine.low %v62_v18, %v62_v18 }
  0x30   :  { %v349_v26 = vld [vmem:[%s577_s2] ss:$0 sm:$0xff]  ;;  %s509_s2 = smov [#allocation8]  }
  0x31   :  { %394 = vmatpush3.bf16.msra.mxu1 %v412_v5  ;;  %355 = vmatpush3.bf16.msra.mxu0 %v412_v5  ;;  %s314_s13 = sshll.u32 %s509_s2, 4  ;;  %s315_s13 = int_to_ptr.vmem [resolvable:$true] %s314_s13 }
  0x32   :  { %387 = vmatprep.subr.bf16.mxu1 %v413_v6  ;;  %356 = vmatprep.subr.bf16.mxu0 %v413_v6  ;;  %s475_s14 = scalar_lea.vmem %s315_s13, 640  ;;  %p480_p3 = scmp.lt.s32.totalorder %s315_s13, %s315_s13 }
  0x33   :  { %p476_p2 = scmp.ne.s32.totalorder %s315_s13, %s475_s14  ;;  %p481_p4 = scmp.lt.s32.totalorder %s475_s14, %s475_s14 }
  0x35   :  { %395 = vmatpush3.bf16.msra.mxu1 %v414_v7  ;;  %357 = vmatpush3.bf16.msra.mxu0 %v414_v7  ;;  %p482_p5 = por %p481_p4, %p480_p3 }
  0x36   :  { %388 = vmatprep.subr.bf16.mxu1 %v415_v8  ;;  %358 = vmatprep.subr.bf16.mxu0 %v415_v8 }
  0x37   :  { %p483_p6 = pnand %p482_p5, %p476_p2 }
  0x39   :  { %396 = vmatpush3.bf16.msra.mxu1 %v416_v9  ;;  %359 = vmatpush3.bf16.msra.mxu0 %v416_v9 }
  0x3a   :  { %389 = vmatprep.subr.bf16.mxu1 %v417_v10  ;;  %360 = vmatprep.subr.bf16.mxu0 %v417_v10 }
  0x3d   :  { %397 = vmatpush3.bf16.msra.mxu1 %v418_v13  ;;  %361 = vmatpush3.bf16.msra.mxu0 %v418_v13 }
  0x3e   :  { %390 = vmatprep.subr.bf16.mxu1 %v419_v14  ;;  %362 = vmatprep.subr.bf16.mxu0 %v419_v14 }
  0x41   :  { %398 = vmatpush3.bf16.msra.mxu1 %v420_v15  ;;  %363 = vmatpush3.bf16.msra.mxu0 %v420_v15 }
  0x42   :  { %391 = vmatprep.subr.bf16.mxu1 %v421_v16  ;;  %364 = vmatprep.subr.bf16.mxu0 %v421_v16 }
  0x45   :  { %399 = vmatpush3.bf16.msra.mxu1 %v422_v17  ;;  %365 = vmatpush3.bf16.msra.mxu0 %v422_v17 }
  0x48   :  { %259 = vmatmul.mubr.bf16.vlgmr.msra.gmra.mrb[0].mxu1 %v423_v19  ;;  %251 = vmatmul.mubr.bf16.vlgmr.msra.gmra.mrb[0].mxu0 %v426_v20 }
  0x49   :  { %266 = vmatprep.mubr.bf16.mxu1 %v332_v21 }
  0x50   :  { %267 = vmatmul.mubr.bf16.gmra.mrb[4].mxu1 %v331_v22 }
 0x11b   :  { %v372_v23 = vpop.f32.mrb[0].mxu1  ;;  %v366_v24 = vpop.f32.mrb[0].mxu0 }
 0x11c   :  { %v373_v25 = vpop.f32.mrb[1].mxu1  ;;  %v367_v27 = vpop.f32.mrb[1].mxu0 }
 0x11d   :  { %v374_v28 = vadd.f32 %v373_v25, %v372_v23  ;;  %v375_v29 = vpop.f32.mrb[2].mxu1  ;;  %v368_v30 = vadd.f32 %v367_v27, %v366_v24  ;;  %v369_v31 = vpop.f32.mrb[2].mxu0 }
 0x11e   :  { %v376_v32 = vpop.f32.mrb[3].mxu1  ;;  %v370_v33 = vpop.f32.mrb[3].mxu0 }
 0x11f   :  { %v301_v34 = vadd.f32 %v374_v28, %v349_v26  ;;  %v377_v35 = vadd.f32 %v376_v32, %v375_v29  ;;  %v299_v36 = vadd.f32 %v368_v30, %v349_v26  ;;  %v371_v37 = vadd.f32 %v370_v33, %v369_v31 }
 0x121   :  { %306 = vst [vmem:[#allocation8 + $0x10] sm:$0xff] %v301_v34  ;;  %v302_v38 = vadd.f32 %v377_v35, %v349_v26  ;;  %304 = vst [vmem:[#allocation8] sm:$0xff] %v299_v36  ;;  %v300_v39 = vadd.f32 %v371_v37, %v349_v26 }
 0x123   :  { %307 = vst [vmem:[#allocation8 + $0x18] sm:$0xff] %v302_v38  ;;  %305 = vst [vmem:[#allocation8 + $0x8] sm:$0xff] %v300_v39  ;;  %v378_v40 = vpop.f32.mrb[4].mxu1 }
 0x124   :  { %v379_v41 = vpop.f32.mrb[5].mxu1 }
 0x125   :  { %v380_v42 = vadd.f32 %v379_v41, %v378_v40  ;;  %v381_v43 = vpop.f32.mrb[6].mxu1 }
 0x126   :  { %v382_v44 = vpop.f32.mrb[7].mxu1 }
 0x127   :  { %v303_v45 = vadd.f32 %v380_v42, %v349_v26 }
 0x129   :  { %308 = vst [vmem:[#allocation8 + $0x20] sm:$0xff] %v303_v45 }
 0x12a   :  { %486 = shalt.err (!%p483_p6)
}
 0x12b   :  { %s487_s17 = scalar_lea.hbm %s578_s3, 640 }
 0x12c   :  { %p488_p7 = scmp.ne.s32.totalorder %s578_s3, %s487_s17  ;;  %p491_p8 = scmp.lt.u32.totalorder %s487_s17, %s578_s3 }
 0x12e   :  { %p493_p9 = pnand %p491_p8, %p488_p7 }
 0x130   :  { %496 = shalt.err (!%p493_p9)
}
 0x131   :  { %320 = dma.vmem_to_hbm [thread:$0]  %s315_s13, 640, %s578_s3, [#allocation5], %s504_s22, %s504_s22, %s505_s23  }
 0x132   :  { %501 = dma.done.wait [#allocation5], 640  }
 0x133   :  { %502 = vsyncadd [#allocation5], 4294966656 }
 0x134   :  { %324 = vsyncpa [#allocation4], 1 }
 0x135   :  { %325 = vsyncpa [#allocation7], 1 }
 0x136   :  { %326 = vsyncpa [#allocation5], 1 }

</bundles_post_ra>
